<compile_context>
chip_gen: v7x
topology: tpu7x:2x2x1
jax: 0.10.0
libtpu: 0.0.40
codegen_flags: <defaults>
</compile_context>

<pallas_src>
import jax
import jax.numpy as jnp
from jax.experimental import pallas as pl
from jax.experimental.pallas import tpu as pltpu


def _attentive_pooling_kernel(x_ref, wfc_ref, w2s_ref, shift_ref, o_ref):
    x = x_ref[0]                                    # (W, C_in, S), f32
    w_dim, c_in, _ = x.shape

    # fc: 1x1 conv (no bias) as a W-batched MXU matmul over the lane-dense S:
    #   att[w, o, s] = sum_c wfc[o, c] * x[w, c, s]
    wfc_b = jnp.broadcast_to(wfc_ref[...][None, :, :], (w_dim, c_in, c_in))
    att = jnp.einsum("woc,wcs->wos", wfc_b, x,
                     preferred_element_type=jnp.float32)        # (W, C_in, S)

    # Numerically-stable softmax over W (leading plane axis -> cheap VPU
    # reductions); normalization folded into the weighted pooling sum so the
    # divide happens once per (C_in, S) element, not per (W, C_in, S).
    m = jnp.max(att, axis=0, keepdims=True)                     # (1, C_in, S)
    e = jnp.exp(att - m)                                        # (W, C_in, S)
    denom = jnp.sum(e, axis=0)                                  # (C_in, S)
    f_num = jnp.sum(x * e, axis=0)                              # (C_in, S)
    # Exact reciprocal keeps rtol=1e-4/atol=1e-5 comfortably; approx=True (EUP
    # slot) is available if a looser tolerance is acceptable.
    f_agg = f_num * pl.reciprocal(denom, approx=False)          # (C_in, S)

    # mlp: 1x1 conv with the eval-mode BN scale pre-folded into the weight
    # rows -> one lane-dense MXU matmul + per-channel shift + LeakyReLU(0.2).
    y = jnp.dot(w2s_ref[...], f_agg,
                preferred_element_type=jnp.float32) + shift_ref[...]   # (C_out, S)
    o_ref[0] = jnp.maximum(y, 0.2 * y)                          # LeakyReLU(0.2)


def _pick_batch_blocks(n, per_item_bytes, max_block_bytes):
    """Split the batch into grid blocks: prefer >=2 steps so both v7x
    TensorCores get work, otherwise as few (big, lane-dense) blocks as
    possible under a conservative per-block VMEM budget."""
    if n <= 1:
        return max(n, 1)
    for nblk in range(2, n + 1):
        if n % nblk == 0 and (n // nblk) * per_item_bytes <= max_block_bytes:
            return nblk
    return n


def _pick_s_chunk(s, per_lane_bytes, max_block_bytes):
    """Chunk the fused (batch-chunk, H) lane axis only when a whole block
    would blow the VMEM budget.  Chunks must be lane-aligned (multiple of
    128) and divide S exactly; otherwise fall back to the full axis."""
    if s * per_lane_bytes <= max_block_bytes:
        return s
    max_lanes = max(128, max_block_bytes // per_lane_bytes)
    c = (max_lanes // 128) * 128
    while c >= 128:
        if s % c == 0:
            return c
        c -= 128
    return s


def attentive_pooling(x, w_fc, w_mlp, b_mlp, gamma, beta, run_mean, run_var, eps=1e-5):
    n, c_in, h, w = x.shape
    c_out = w_mlp.shape[0]

    # Fold conv bias + eval-mode BatchNorm into the mlp weight (scale) and a
    # per-channel shift: y = (scale*W_mlp) @ f + (beta + (b - mean)*scale).
    # TODO(synk): training-mode BatchNorm (batch statistics) not implemented;
    # eval-mode running-stats BN semantics are used.
    scale = gamma / jnp.sqrt(run_var + eps)
    shift = (beta + (b_mlp - run_mean) * scale).reshape(c_out, 1).astype(jnp.float32)
    w_mlp_s = (w_mlp * scale[:, None]).astype(jnp.float32)       # (C_out, C_in)

    max_block_bytes = 2 << 20
    n_blocks = _pick_batch_blocks(n, c_in * h * w * 4, max_block_bytes)
    nb = n // n_blocks
    s = nb * h                                    # fused (batch-chunk, H) lane axis
    s_chunk = _pick_s_chunk(s, w * c_in * 4, max_block_bytes)
    s_blocks = s // s_chunk

    # Wrapper-side layout plumbing (free for the kernel): NCHW -> per-block
    # slabs of shape (W, C_in, nb*H).
    x_prep = (x.astype(jnp.float32)
               .reshape(n_blocks, nb, c_in, h, w)
               .transpose(0, 4, 2, 1, 3)          # (blk, W, C_in, nb, H)
               .reshape(n_blocks, w, c_in, s))

    out = pl.pallas_call(
        _attentive_pooling_kernel,
        out_shape=jax.ShapeDtypeStruct((n_blocks, c_out, s), jnp.float32),
        grid_spec=pltpu.PrefetchScalarGridSpec(
            num_scalar_prefetch=0,
            grid=(n_blocks, s_blocks),
            in_specs=[
                pl.BlockSpec((1, w, c_in, s_chunk), lambda i, j: (i, 0, 0, j)),
                pl.BlockSpec((c_in, c_in), lambda i, j: (0, 0)),
                pl.BlockSpec((c_out, c_in), lambda i, j: (0, 0)),
                pl.BlockSpec((c_out, 1), lambda i, j: (0, 0)),
            ],
            out_specs=pl.BlockSpec((1, c_out, s_chunk), lambda i, j: (i, 0, j)),
        ),
        compiler_params=pltpu.CompilerParams(
            dimension_semantics=("parallel", "parallel"),
            vmem_limit_bytes=32 * 1024 * 1024,
        ),
    )(x_prep, w_fc.astype(jnp.float32), w_mlp_s, shift)

    # (n_blocks, C_out, nb*H) -> (N, C_out, H, 1), matching PyTorch NCHW output.
    out = (out.reshape(n_blocks, c_out, nb, h)
              .transpose(0, 2, 1, 3)
              .reshape(n, c_out, h))
    return out[..., None]


def reference(x, w_fc, w_mlp, b_mlp, gamma, beta, run_mean, run_var, eps=1e-5):
    att = jnp.einsum("oc,nchw->nohw", w_fc, x)
    scores = jax.nn.softmax(att, axis=3)
    f = jnp.sum(x * scores, axis=3, keepdims=True)                    # (N, C_in, H, 1)
    y = jnp.einsum("oc,nchw->nohw", w_mlp, f) + b_mlp[None, :, None, None]
    y = (y - run_mean[None, :, None, None]) / jnp.sqrt(run_var[None, :, None, None] + eps)
    y = y * gamma[None, :, None, None] + beta[None, :, None, None]
    return jnp.where(y > 0, y, 0.2 * y)


if __name__ == "__main__":
    N, D_IN, H, W, D_OUT = 2, 4, 16, 16, 8

    key = jax.random.PRNGKey(0)
    ks = jax.random.split(key, 8)
    x = jax.random.normal(ks[0], (N, D_IN, H, W), dtype=jnp.float32)

    # deterministic synthetic parameters (shapes from the module's __init__)
    w_fc = 0.2 * jax.random.normal(ks[1], (D_IN, D_IN), dtype=jnp.float32)    # Conv2d(d_in,d_in,1,bias=False)
    w_mlp = 0.2 * jax.random.normal(ks[2], (D_OUT, D_IN), dtype=jnp.float32)  # Conv2d(d_in,d_out,1)
    b_mlp = 0.1 * jax.random.normal(ks[3], (D_OUT,), dtype=jnp.float32)
    gamma = 1.0 + 0.1 * jax.random.normal(ks[4], (D_OUT,), dtype=jnp.float32)  # BatchNorm2d(d_out)
    beta = 0.05 * jax.random.normal(ks[5], (D_OUT,), dtype=jnp.float32)
    run_mean = 0.1 * jax.random.normal(ks[6], (D_OUT,), dtype=jnp.float32)
    run_var = 0.5 + jnp.abs(jax.random.normal(ks[7], (D_OUT,), dtype=jnp.float32)) * 0.5

    out = attentive_pooling(x, w_fc, w_mlp, b_mlp, gamma, beta, run_mean, run_var)
    out = jax.block_until_ready(out)

    ref = reference(x, w_fc, w_mlp, b_mlp, gamma, beta, run_mean, run_var)
    assert out.shape == (N, D_OUT, H, 1), out.shape
    assert jnp.allclose(out, ref, rtol=1e-4, atol=1e-5), float(jnp.max(jnp.abs(out - ref)))

    print("KERNEL_OK")
</pallas_src>

<mosaic_0001>
module attributes {stable_mosaic.version = 11 : i64} {
  func.func @_attentive_pooling_kernel(%arg0: i32, %arg1: i32, %arg2: memref<1x16x4x16xf32, #tpu.memory_space<vmem>>, %arg3: memref<4x4xf32, #tpu.memory_space<vmem>>, %arg4: memref<8x4xf32, #tpu.memory_space<vmem>>, %arg5: memref<8x1xf32, #tpu.memory_space<vmem>>, %arg6: memref<1x8x16xf32, #tpu.memory_space<vmem>>) attributes {dimension_semantics = [#tpu.dimension_semantics<parallel>, #tpu.dimension_semantics<parallel>], iteration_bounds = array<i64: 2, 1>, scalar_prefetch = 0 : i64, scratch_operands = 0 : i64, tpu.core_type = #tpu.core_type<tc>, window_params = [{transform_indices = @transform_0, window_bounds = array<i64: 1, 16, 4, 16>}, {pipeline_mode = #tpu.pipeline_mode<synchronous>, transform_indices = @transform_1, window_bounds = array<i64: 4, 4>}, {pipeline_mode = #tpu.pipeline_mode<synchronous>, transform_indices = @transform_2, window_bounds = array<i64: 8, 4>}, {pipeline_mode = #tpu.pipeline_mode<synchronous>, transform_indices = @transform_3, window_bounds = array<i64: 8, 1>}, {transform_indices = @transform_4, window_bounds = array<i64: 1, 8, 16>}]} {
    %c0 = arith.constant 0 : index
    %c0_0 = arith.constant 0 : index
    %c0_1 = arith.constant 0 : index
    %c0_2 = arith.constant 0 : index
    %0 = vector.load %arg2[%c0, %c0_0, %c0_1, %c0_2] : memref<1x16x4x16xf32, #tpu.memory_space<vmem>>, vector<1x16x4x16xf32>
    %1 = vector.shape_cast %0 : vector<1x16x4x16xf32> to vector<16x4x16xf32>
    %c0_3 = arith.constant 0 : index
    %c0_4 = arith.constant 0 : index
    %2 = vector.load %arg3[%c0_3, %c0_4] : memref<4x4xf32, #tpu.memory_space<vmem>>, vector<4x4xf32>
    %3 = vector.shape_cast %2 : vector<4x4xf32> to vector<1x4x4xf32>
    %4 = vector.shape_cast %3 : vector<1x4x4xf32> to vector<1x4x4xf32>
    %5 = vector.broadcast %4 : vector<1x4x4xf32> to vector<16x4x4xf32>
    "tpu.trace_start"() <{level = 10 : i32, message = "woc,wcs->wos"}> : () -> ()
    %cst = arith.constant dense<0.000000e+00> : vector<16x4x16xf32>
    %6 = tpu.matmul %5, %1, %cst {dimension_numbers = #tpu.dot_dimension_numbers<[2], [1], [1], [2], [0, 0, 0, 1, 1, 2], [0], [0]>} : vector<16x4x4xf32>, vector<16x4x16xf32>, vector<16x4x16xf32> -> vector<16x4x16xf32>
    "tpu.trace_stop"() : () -> ()
    %cst_5 = arith.constant dense<0xFF800000> : vector<4x16xf32>
    %7 = vector.multi_reduction <maximumf>, %6, %cst_5 [0] : vector<16x4x16xf32> to vector<4x16xf32>
    %8 = vector.shape_cast %7 : vector<4x16xf32> to vector<1x4x16xf32>
    %9 = vector.broadcast %8 : vector<1x4x16xf32> to vector<16x4x16xf32>
    %10 = arith.subf %6, %9 : vector<16x4x16xf32>
    %11 = math.exp %10 : vector<16x4x16xf32>
    %cst_6 = arith.constant dense<0.000000e+00> : vector<4x16xf32>
    %12 = vector.multi_reduction <add>, %11, %cst_6 [0] : vector<16x4x16xf32> to vector<4x16xf32>
    %13 = arith.mulf %1, %11 : vector<16x4x16xf32>
    %cst_7 = arith.constant dense<0.000000e+00> : vector<4x16xf32>
    %14 = vector.multi_reduction <add>, %13, %cst_7 [0] : vector<16x4x16xf32> to vector<4x16xf32>
    %15 = tpu.reciprocal %12 : vector<4x16xf32> -> vector<4x16xf32>
    %16 = arith.mulf %14, %15 : vector<4x16xf32>
    %c0_8 = arith.constant 0 : index
    %c0_9 = arith.constant 0 : index
    %17 = vector.load %arg4[%c0_8, %c0_9] : memref<8x4xf32, #tpu.memory_space<vmem>>, vector<8x4xf32>
    %cst_10 = arith.constant dense<0.000000e+00> : vector<8x16xf32>
    %18 = tpu.matmul %17, %16, %cst_10 {dimension_numbers = #tpu.dot_dimension_numbers<[1], [0], [0], [1], [0, 0, 1, 1], [], []>} : vector<8x4xf32>, vector<4x16xf32>, vector<8x16xf32> -> vector<8x16xf32>
    %c0_11 = arith.constant 0 : index
    %c0_12 = arith.constant 0 : index
    %19 = vector.load %arg5[%c0_11, %c0_12] : memref<8x1xf32, #tpu.memory_space<vmem>>, vector<8x1xf32>
    %20 = vector.broadcast %19 : vector<8x1xf32> to vector<8x16xf32>
    %21 = arith.addf %18, %20 : vector<8x16xf32>
    %cst_13 = arith.constant 2.000000e-01 : f32
    %22 = vector.broadcast %cst_13 : f32 to vector<8x16xf32>
    %23 = arith.mulf %22, %21 : vector<8x16xf32>
    %24 = arith.maximumf %21, %23 : vector<8x16xf32>
    %c0_14 = arith.constant 0 : index
    %c0_15 = arith.constant 0 : index
    %c0_16 = arith.constant 0 : index
    %25 = vector.load %arg6[%c0_14, %c0_15, %c0_16] : memref<1x8x16xf32, #tpu.memory_space<vmem>>, vector<1x8x16xf32>
    %26 = vector.shape_cast %25 : vector<1x8x16xf32> to vector<8x16xf32>
    %27 = vector.shape_cast %24 : vector<8x16xf32> to vector<1x8x16xf32>
    tpu.vector_store %arg6[%c0_14, %c0_15, %c0_16], %27 {strides = array<i32>} : memref<1x8x16xf32, #tpu.memory_space<vmem>>, vector<1x8x16xf32>,
    return
  }
  func.func @transform_0(%arg0: i32, %arg1: i32) -> (i32, i32, i32, i32) {
    %c0_i32 = arith.constant 0 : i32
    %c0_i32_0 = arith.constant 0 : i32
    %c0_i32_1 = arith.constant 0 : i32
    return %arg0, %c0_i32, %c0_i32_0, %arg1 : i32, i32, i32, i32
  }
  func.func @transform_1(%arg0: i32, %arg1: i32) -> (i32, i32) {
    %c0_i32 = arith.constant 0 : i32
    %c0_i32_0 = arith.constant 0 : i32
    %c0_i32_1 = arith.constant 0 : i32
    return %c0_i32, %c0_i32_0 : i32, i32
  }
  func.func @transform_2(%arg0: i32, %arg1: i32) -> (i32, i32) {
    %c0_i32 = arith.constant 0 : i32
    %c0_i32_0 = arith.constant 0 : i32
    %c0_i32_1 = arith.constant 0 : i32
    return %c0_i32, %c0_i32_0 : i32, i32
  }
  func.func @transform_3(%arg0: i32, %arg1: i32) -> (i32, i32) {
    %c0_i32 = arith.constant 0 : i32
    %c0_i32_0 = arith.constant 0 : i32
    %c0_i32_1 = arith.constant 0 : i32
    return %c0_i32, %c0_i32_0 : i32, i32
  }
  func.func @transform_4(%arg0: i32, %arg1: i32) -> (i32, i32, i32) {
    %c0_i32 = arith.constant 0 : i32
    %c0_i32_0 = arith.constant 0 : i32
    return %arg0, %c0_i32, %arg1 : i32, i32, i32
  }
}

</mosaic_0001>

<bundles_post_ra>
// kernel: tpu_custom_call.1
= control target key start
LH: loop header
LB: loop body
LE: loop exit
PB: predicated region body
PF: predicated region fallthrough
CT: control target
= control target key end

     0   :  { %9 = vsyncpa [#allocation3], 0  ;;  %s2683_s0 = inlined_call_operand.hbm [shape: f32[2,16,4,16], index: 0, kind: input, shape index: {}]   ;;  %s2684_s1 = inlined_call_operand.vmem [shape: f32[4,4], index: 1, kind: input, shape index: {}]   ;;  %s2685_s2 = inlined_call_operand.vmem [shape: f32[8,4], index: 2, kind: input, shape index: {}]   ;;  %s2686_s3 = inlined_call_operand.vmem [shape: f32[8,1], index: 3, kind: input, shape index: {}]   ;;  %s2687_s4 = inlined_call_operand.hbm [shape: f32[2,8,16], index: 4, kind: output, shape index: {}]  }
   0x1   :  { %11 = vsyncpa [#allocation3 + $0x1], 0 }
   0x2   :  { %12 = vsyncpa [#allocation4], 0 }
   0x3   :  { %14 = vsyncpa [#allocation4 + $0x1], 0  ;;  %s2182_s15 = smov 0   ;;  %s2184_s16 = smov 0  }
   0x4   :  { %s2186_s17 = smov 0   ;;  %s2188_s18 = smov 0  }
   0x5   :  { %s2190_s19 = smov 0   ;;  %s2192_s20 = smov 0  }
   0x6 LB: > { %s1766_s21 = sadd.s32 4294967295, %s2148_s20   ;;  %s1767_s22 = sadd.s32 4294967294, %s2148_s20   ;;  %s2148_s20 = sphi %s2192_s20, %s20_s20   ;;  %s2144_s19 = sphi %s2190_s19, %s2702_s19   ;;  %s2140_s18 = sphi %s2188_s18, %s2701_s18   ;;  %s2136_s17 = sphi %s2186_s17, %s2700_s17   ;;  %s2132_s16 = sphi %s2184_s16, %s2699_s16   ;;  %s2128_s15 = sphi %s2182_s15, %s2698_s15  }
   0x7   : > { %s32_s23 = sadd.s32 1, %s2144_s19  ;;  %s41_s24 = sadd.s32 1, %s2136_s17 }
   0x8   : > { %p34_p0 = scmp.ge.s32.totalorder %s32_s23, 2  ;;  %p48_p1 = scmp.ne.s32.totalorder %s2136_s17, %s2132_s16 }
   0x9   : > { %p49_p2 = scmp.eq.s32.totalorder %s2148_s20, 0  ;;  %p54_p3 = scmp.ne.s32.totalorder %s2132_s16, %s2128_s15 }
   0xa   : > { %s2704_s23 = smov (%p34_p0, %s32_s23), 0  ;;  %p55_p5 = scmp.eq.s32.totalorder %s1766_s21, 0 }
   0xb   : > { %p2223_p4 = por %p49_p2, %p48_p1  ;;  %s36_s26 = ssub.s32 %s2144_s19, %s2704_s23 }
   0xc   : > { %p143_p6 = scmp.eq.s32.totalorder %s1766_s21, 1  ;;  %p39_p7 = scmp.eq.s32.totalorder %s36_s26, 0 }
   0xd   : > { %p2229_p8 = por %p55_p5, %p54_p3  ;;  %p149_p10 = scmp.eq.s32.totalorder %s1767_s22, 1 }
   0xe   : > { %p2233_p9 = por %p143_p6, %p48_p1  ;;  %p1946_p13 = scmp.lt.s32.totalorder %s2148_s20, 2 }
   0xf   : > { %s2238_s29 = scalar_select %p39_p7, %s2136_s17, %s41_s24  }
  0x10   : > { %s2691_s28 = scalar_select %p2233_p9, 1, 0 }
  0x11   : > { %p2240_p11 = por %p149_p10, %p54_p3  ;;  %s178_s5 = sand.u32 1, %s2136_s17  }
  0x12   : > { %s1770_s6 = sshll.u32 %s178_s5, 6  ;;  %s1814_s7 = sshll.u32 %s2144_s19, 10 }
  0x13   : > { %s2692_s30 = scalar_select %p2240_p11, 1, 0 }
  0x14   : > { %s2251_s10 = scalar_lea.hbm %s2683_s0, %s1814_s7  ;;  %s182_s11 = scalar_lea.vmem [#allocation2], %s1770_s6 }
  0x15   : > { %s190_s12 = sshll.u32 %s182_s11, 4  ;;  %p2257_p0 = pnand %p1946_p13, %p2223_p4  ;;  %s2253_s12 = int_to_ptr.vmem [resolvable:$true] %s190_s12 }
  0x16   : > { %s2262_s14 = scalar_lea.sflag [#allocation3], %s178_s5  ;;  %s2036_s21 = scalar_lea.hbm %s2251_s10, 1024 }
  0x17   : > { %p2037_p2 = scmp.ne.s32.totalorder %s2251_s10, %s2036_s21  ;;  %p2038_p3 = pneg %p2257_p0 }
  0x18   : > { %s2041_s25 = scalar_lea.hbm %s2683_s0, 2048  ;;  %p2042_p4 = scmp.lt.u32.totalorder %s2251_s10, %s2683_s0 }
  0x19   : > { %p2039_p5 = pnand %p2038_p3, %p2037_p2  ;;  %p2043_p7 = scmp.lt.u32.totalorder %s2041_s25, %s2036_s21 }
  0x1a   : > { %p2045_p13 = scmp.lt.u32.totalorder %s2036_s21, %s2251_s10 }
  0x1b   : > { %p2040_p6 = pneg %p2039_p5  ;;  %p2044_p10 = por %p2043_p7, %p2042_p4 }
  0x1d   : > { %p2046_p12 = por %p2045_p13, %p2044_p10 }
  0x1f   : > { %p2047_p1 = pnand %p2046_p12, %p2040_p6 }
  0x21   : > { %2050 = shalt.err (!%p2047_p1)
}
  0x22   : > { %s2051_s5 = scalar_lea.vmem %s2253_s12, 1024  ;;  %s2150_s7 = smov [#allocation2]  }
  0x23   : > { %p2052_p2 = scmp.ne.s32.totalorder %s2253_s12, %s2051_s5  ;;  %s2056_s8 = sshll.u32 %s2150_s7, 4  ;;  %s2057_s8 = int_to_ptr.vmem [resolvable:$false] %s2056_s8 }
  0x24   : > { %s2058_s9 = scalar_lea.vmem %s2057_s8, 2048  ;;  %p2059_p9 = scmp.lt.s32.totalorder %s2253_s12, %s2057_s8 }
  0x25   : > { %p2054_p5 = pnand %p2052_p2, %p2038_p3  ;;  %p2060_p4 = scmp.lt.s32.totalorder %s2058_s9, %s2051_s5 }
  0x27   : > { %p2055_p11 = pneg %p2054_p5  ;;  %p2061_p7 = por %p2060_p4, %p2059_p9 }
  0x29   : > { %p2062_p10 = pnand %p2061_p7, %p2055_p11 }
  0x2b   : > { %2065 = shalt.err (!%p2062_p10)
}
  0x2c   : > { %s2151_s11 = smov 64   ;;  %s2152_s21 = smov 4  }
  0x2d   : > { %1941 = dma.hbm_to_vmem [thread:$0]  (!%p2257_p0), %s2251_s10, 1024, %s2253_s12, %s2262_s14, %s2151_s11, %s2151_s11, %s2152_s21  }
  0x2e   : > { %p198_p12 = scmp.lt.s32.totalorder %s2148_s20, 3  ;;  %p2694_p1 = scmp.ge.s32.totalorder %s2148_s20, 1 }
  0x30   : > { %p199_p3 = pnand %p2694_p1, %p198_p12 }
  0x31   : > { %s2294_s22 = sand.u32 (!%p199_p3), 1, %s2132_s16  }
  0x32   : > { %202 = sbr.rel (%p199_p3) target bundleno = 604 (0x25c), region = 36  ;;  %s1774_s24 = sshll.u32 (!%p199_p3), %s2294_s22, 6 }
  0x33   : > { %s205_s25 = scalar_lea.sflag (!%p199_p3), [#allocation3], %s2294_s22  ;;  %s2298_s26 = scalar_lea.vmem (!%p199_p3), [#allocation2], %s1774_s24 }
  0x39   : > { %2119 = dma.done.wait (%p2229_p8), %s205_s25, 1024  }
  0x3a   : > { %2121 = vsyncadd (%p2229_p8), %s205_s25, 4294966272  ;;  %v2153_v0 = vmov 0.0   ;;  %vm2154_vm0 = vmmov 0   ;;  %vm254_vm1 = vcmask 1043456   ;;  %vm250_vm2 = vcmask 31744   ;;  %v1584_v18 = vld [vmem:[%s2686_s3] sm:$0xff] }
  0x3b   : > { %1849 = vmatprep.subr.mxu0 %v2153_v0  ;;  %1854 = vmatprep.subr.mxu1 %v2153_v0  ;;  %v2311_v1 = vld [vmem:[%s2298_s26] sm:$0xf]  ;;  %v2314_v2 = vld [vmem:[%s2298_s26 + $0x4] sm:$0xf]  ;;  %v2326_v4 = vld [vmem:[%s2298_s26 + $0x8] sm:$0xf] }
  0x3c   : > { %1851 = vmatprep.mubr.msk.f32.mxu0 %vm2154_vm0, %v2153_v0  ;;  %1856 = vmatprep.mubr.msk.f32.mxu1 %vm2154_vm0, %v2153_v0  ;;  %v2319_v3 = vld [vmem:[%s2684_s1] sm:$0xf]  ;;  %v2333_v5 = vld [vmem:[%s2298_s26 + $0xc] sm:$0xf]  ;;  %v2346_v6 = vld [vmem:[%s2298_s26 + $0x10] sm:$0xf] }
  0x3d   : > { %1850 = vmatpush3.msk.msra.mxu0 %vm254_vm1, %v2311_v1  ;;  %1855 = vmatpush3.msk.msra.mxu1 %vm254_vm1, %v2314_v2  ;;  %v2353_v7 = vld [vmem:[%s2298_s26 + $0x14] sm:$0xf]  ;;  %v2366_v8 = vld [vmem:[%s2298_s26 + $0x18] sm:$0xf]  ;;  %v2373_v9 = vld [vmem:[%s2298_s26 + $0x1c] sm:$0xf] }
  0x3e   : > { %1852 = vmatmul.mubr.msk.f32.vlgmr.msra.gmra.mrb[0].mxu0 %vm250_vm2, %v2319_v3  ;;  %1857 = vmatmul.mubr.msk.f32.vlgmr.msra.gmra.mrb[0].mxu1 %vm250_vm2, %v2319_v3  ;;  %v2386_v10 = vld [vmem:[%s2298_s26 + $0x20] sm:$0xf]  ;;  %v2393_v11 = vld [vmem:[%s2298_s26 + $0x24] sm:$0xf]  ;;  %v2406_v12 = vld [vmem:[%s2298_s26 + $0x28] sm:$0xf] }
  0x3f   : > { %1859 = vmatprep.subr.mxu0 %v2153_v0  ;;  %1864 = vmatprep.subr.mxu1 %v2153_v0  ;;  %v2413_v13 = vld [vmem:[%s2298_s26 + $0x2c] sm:$0xf]  ;;  %v2426_v14 = vld [vmem:[%s2298_s26 + $0x30] sm:$0xf]  ;;  %v2433_v15 = vld [vmem:[%s2298_s26 + $0x34] sm:$0xf] }
  0x40   : > { %1860 = vmatpush3.msk.msra.mxu0 %vm254_vm1, %v2326_v4  ;;  %1861 = vmatprep.mubr.msk.f32.mxu0 %vm2154_vm0, %v2153_v0  ;;  %v2446_v16 = vld [vmem:[%s2298_s26 + $0x38] sm:$0xf]  ;;  %v2453_v17 = vld [vmem:[%s2298_s26 + $0x3c] sm:$0xf]  ;;  %v2155_v19 = vmov 0   ;;  %vm1423_vm3 = vcmask 125952  }
  0x41   : > { %1865 = vmatpush3.msk.msra.mxu1 %vm254_vm1, %v2333_v5  ;;  %1866 = vmatprep.mubr.msk.f32.mxu1 %vm2154_vm0, %v2153_v0  ;;  %s1775_s5 = sshll.u32 %s2294_s22, 3  ;;  %s1811_s7 = sshll.u32 %s2140_s18, 7  ;;  %vm1668_vm4 = vcmask 130048  }
  0x42   : > { %1862 = vmatmul.mubr.msk.f32.vlgmr.msra.gmra.mrb[2].mxu0 %vm250_vm2, %v2319_v3  ;;  %1867 = vmatmul.mubr.msk.f32.vlgmr.msra.gmra.mrb[2].mxu1 %vm250_vm2, %v2319_v3  ;;  %s232_s8 = scalar_lea.vmem [#allocation5], %s1775_s5  ;;  %s2634_s24 = scalar_lea.hbm %s2687_s4, %s1811_s7 }
  0x43   : > { %1869 = vmatprep.subr.mxu0 %v2153_v0  ;;  %1874 = vmatprep.subr.mxu1 %v2153_v0  ;;  %s1685_s9 = sshll.u32 %s232_s8, 4  ;;  %s1671_s25 = scalar_lea.sflag [#allocation4], %s2294_s22  ;;  %s2636_s9 = int_to_ptr.vmem [resolvable:$true] %s1685_s9 }
  0x44   : > { %1870 = vmatpush3.msk.msra.mxu0 %vm254_vm1, %v2346_v6  ;;  %1871 = vmatprep.mubr.msk.f32.mxu0 %vm2154_vm0, %v2153_v0  ;;  %s2066_s26 = scalar_lea.vmem %s2636_s9, 128  ;;  %p2695_p9 = scmp.ne.s32.totalorder %s2691_s28, 0 }
  0x45   : > { %1875 = vmatpush3.msk.msra.mxu1 %vm254_vm1, %v2353_v7  ;;  %1876 = vmatprep.mubr.msk.f32.mxu1 %vm2154_vm0, %v2153_v0  ;;  %p2067_p8 = scmp.ne.s32.totalorder %s2636_s9, %s2066_s26  ;;  %s2156_s18 = smov [#allocation5]  }
  0x46   : > { %1872 = vmatmul.mubr.msk.f32.vlgmr.msra.gmra.mrb[4].mxu0 %vm250_vm2, %v2319_v3  ;;  %1877 = vmatmul.mubr.msk.f32.vlgmr.msra.gmra.mrb[4].mxu1 %vm250_vm2, %v2319_v3  ;;  %s2070_s27 = sshll.u32 %s2156_s18, 4  ;;  %s2071_s27 = int_to_ptr.vmem [resolvable:$false] %s2070_s27 }
  0x47   : > { %1879 = vmatprep.subr.mxu0 %v2153_v0  ;;  %1884 = vmatprep.subr.mxu1 %v2153_v0  ;;  %p2068_p11 = pnand %p2067_p8, %p2695_p9  ;;  %s2072_s10 = scalar_lea.vmem %s2071_s27, 256 }
  0x48   : > { %1880 = vmatpush3.msk.msra.mxu0 %vm254_vm1, %v2366_v8  ;;  %1881 = vmatprep.mubr.msk.f32.mxu0 %vm2154_vm0, %v2153_v0  ;;  %p2073_p6 = scmp.lt.s32.totalorder %s2636_s9, %s2071_s27  ;;  %p2074_p13 = scmp.lt.s32.totalorder %s2072_s10, %s2066_s26 }
  0x49   : > { %1885 = vmatpush3.msk.msra.mxu1 %vm254_vm1, %v2373_v9  ;;  %1886 = vmatprep.mubr.msk.f32.mxu1 %vm2154_vm0, %v2153_v0  ;;  %p2069_p0 = pneg %p2068_p11 }
  0x4a   : > { %1882 = vmatmul.mubr.msk.f32.vlgmr.msra.gmra.mrb[6].mxu0 %vm250_vm2, %v2319_v3  ;;  %1887 = vmatmul.mubr.msk.f32.vlgmr.msra.gmra.mrb[6].mxu1 %vm250_vm2, %v2319_v3  ;;  %p2075_p2 = por %p2074_p13, %p2073_p6 }
  0x4b   : > { %1889 = vmatprep.subr.mxu0 %v2153_v0  ;;  %1894 = vmatprep.subr.mxu1 %v2153_v0 }
  0x4c   : > { %1890 = vmatpush3.msk.msra.mxu0 %vm254_vm1, %v2386_v10  ;;  %1891 = vmatprep.mubr.msk.f32.mxu0 %vm2154_vm0, %v2153_v0  ;;  %p2076_p5 = pnand %p2075_p2, %p2069_p0 }
  0x4d   : > { %1895 = vmatpush3.msk.msra.mxu1 %vm254_vm1, %v2393_v11  ;;  %1896 = vmatprep.mubr.msk.f32.mxu1 %vm2154_vm0, %v2153_v0 }
  0x4e   : > { %1892 = vmatmul.mubr.msk.f32.vlgmr.msra.gmra.mrb[8].mxu0 %vm250_vm2, %v2319_v3  ;;  %1897 = vmatmul.mubr.msk.f32.vlgmr.msra.gmra.mrb[8].mxu1 %vm250_vm2, %v2319_v3 }
  0x4f   : > { %1899 = vmatprep.subr.mxu0 %v2153_v0  ;;  %1904 = vmatprep.subr.mxu1 %v2153_v0 }
  0x50   : > { %1900 = vmatpush3.msk.msra.mxu0 %vm254_vm1, %v2406_v12  ;;  %1901 = vmatprep.mubr.msk.f32.mxu0 %vm2154_vm0, %v2153_v0 }
  0x51   : > { %1905 = vmatpush3.msk.msra.mxu1 %vm254_vm1, %v2413_v13  ;;  %1906 = vmatprep.mubr.msk.f32.mxu1 %vm2154_vm0, %v2153_v0 }
  0x52   : > { %1902 = vmatmul.mubr.msk.f32.vlgmr.msra.gmra.mrb[10].mxu0 %vm250_vm2, %v2319_v3  ;;  %1907 = vmatmul.mubr.msk.f32.vlgmr.msra.gmra.mrb[10].mxu1 %vm250_vm2, %v2319_v3 }
  0x53   : > { %1909 = vmatprep.subr.mxu0 %v2153_v0  ;;  %1914 = vmatprep.subr.mxu1 %v2153_v0 }
  0x54   : > { %1910 = vmatpush3.msk.msra.mxu0 %vm254_vm1, %v2426_v14  ;;  %1911 = vmatprep.mubr.msk.f32.mxu0 %vm2154_vm0, %v2153_v0 }
  0x55   : > { %1915 = vmatpush3.msk.msra.mxu1 %vm254_vm1, %v2433_v15  ;;  %1916 = vmatprep.mubr.msk.f32.mxu1 %vm2154_vm0, %v2153_v0 }
  0x56   : > { %1912 = vmatmul.mubr.msk.f32.vlgmr.msra.gmra.mrb[12].mxu0 %vm250_vm2, %v2319_v3  ;;  %1917 = vmatmul.mubr.msk.f32.vlgmr.msra.gmra.mrb[12].mxu1 %vm250_vm2, %v2319_v3 }
  0x57   : > { %1919 = vmatprep.subr.mxu0 %v2153_v0  ;;  %1924 = vmatprep.subr.mxu1 %v2153_v0 }
  0x58   : > { %1920 = vmatpush3.msk.msra.mxu0 %vm254_vm1, %v2446_v16  ;;  %1921 = vmatprep.mubr.msk.f32.mxu0 %vm2154_vm0, %v2153_v0 }
  0x59   : > { %1925 = vmatpush3.msk.msra.mxu1 %vm254_vm1, %v2453_v17  ;;  %1926 = vmatprep.mubr.msk.f32.mxu1 %vm2154_vm0, %v2153_v0 }
  0x5a   : > { %1922 = vmatmul.mubr.msk.f32.vlgmr.msra.gmra.mrb[14].mxu0 %vm250_vm2, %v2319_v3  ;;  %1927 = vmatmul.mubr.msk.f32.vlgmr.msra.gmra.mrb[14].mxu1 %vm250_vm2, %v2319_v3 }
  0x5b   : > { %1929 = vmatprep.subr.mxu0 %v2153_v0  ;;  %1931 = vmatprep.mubr.msk.f32.mxu0 %vm2154_vm0, %v2153_v0 }
  0x5c   : > { %2001 = vset.pattern.permute.xlu0 %v2155_v19 }
  0x5d   : > { %1587 = vperm.xlu0 %2001, %v1584_v18  }
 0x111   : > { %v2475_v20 = vpop.f32.mrb[0].mxu0  ;;  %v2477_v21 = vpop.f32.mrb[0].mxu1 }
 0x112   : > { %v1853_v22 = vpop.f32.mrb[1].mxu0  ;;  %v1858_v23 = vpop.f32.mrb[1].mxu1  ;;  %v1424_v30 = vsel %vm1423_vm3, %v2475_v20, -inf  ;;  %v1425_v31 = vsel %vm1423_vm3, %v2477_v21, -inf }
 0x115   : > { %v2479_v24 = vpop.f32.mrb[2].mxu0  ;;  %v2481_v25 = vpop.f32.mrb[2].mxu1 }
 0x116   : > { %v1863_v26 = vpop.f32.mrb[3].mxu0  ;;  %v1868_v27 = vpop.f32.mrb[3].mxu1  ;;  %v1426_v40 = vsel %vm1423_vm3, %v2479_v24, -inf  ;;  %v1427_v41 = vsel %vm1423_vm3, %v2481_v25, -inf }
 0x119   : > { %v2483_v28 = vpop.f32.mrb[4].mxu0  ;;  %v2485_v29 = vpop.f32.mrb[4].mxu1 }
 0x11a   : > { %v1428_v32 = vsel %vm1423_vm3, %v2483_v28, -inf  ;;  %v1430_v33 = vsel %vm1423_vm3, %v2485_v29, -inf  ;;  %v1873_v34 = vpop.f32.mrb[5].mxu0  ;;  %v1878_v35 = vpop.f32.mrb[5].mxu1 }
 0x11b   : > { %v1429_v36 = vmax.f32 %v1424_v30, %v1428_v32  ;;  %v1431_v37 = vmax.f32 %v1425_v31, %v1430_v33 }
 0x11d   : > { %v2495_v38 = vpop.f32.mrb[6].mxu0  ;;  %v2497_v39 = vpop.f32.mrb[6].mxu1 }
 0x11e   : > { %v1432_v42 = vsel %vm1423_vm3, %v2495_v38, -inf  ;;  %v1434_v43 = vsel %vm1423_vm3, %v2497_v39, -inf  ;;  %v1883_v44 = vpop.f32.mrb[7].mxu0  ;;  %v1888_v45 = vpop.f32.mrb[7].mxu1 }
 0x11f   : > { %v1433_v46 = vmax.f32 %v1426_v40, %v1432_v42  ;;  %v1435_v47 = vmax.f32 %v1427_v41, %v1434_v43 }
 0x121   : > { %v2507_v48 = vpop.f32.mrb[8].mxu0  ;;  %v2509_v49 = vpop.f32.mrb[8].mxu1 }
 0x122   : > { %v1436_v50 = vsel %vm1423_vm3, %v2507_v48, -inf  ;;  %v1438_v51 = vsel %vm1423_vm3, %v2509_v49, -inf  ;;  %v1893_v52 = vpop.f32.mrb[9].mxu0  ;;  %v1898_v53 = vpop.f32.mrb[9].mxu1 }
 0x123   : > { %v1437_v54 = vmax.f32 %v1429_v36, %v1436_v50  ;;  %v1439_v55 = vmax.f32 %v1431_v37, %v1438_v51 }
 0x125   : > { %v2515_v56 = vpop.f32.mrb[10].mxu0  ;;  %v2517_v57 = vpop.f32.mrb[10].mxu1 }
 0x126   : > { %v1440_v58 = vsel %vm1423_vm3, %v2515_v56, -inf  ;;  %v1442_v59 = vsel %vm1423_vm3, %v2517_v57, -inf  ;;  %v1903_v60 = vpop.f32.mrb[11].mxu0  ;;  %v1908_v61 = vpop.f32.mrb[11].mxu1 }
 0x127   : > { %v1441_v62 = vmax.f32 %v1433_v46, %v1440_v58  ;;  %v1443_v63 = vmax.f32 %v1435_v47, %v1442_v59 }
 0x129   : > { %v2523_v0 = vpop.f32.mrb[12].mxu0  ;;  %v2525_v3 = vpop.f32.mrb[12].mxu1 }
 0x12a   : > { %v1444_v18 = vsel %vm1423_vm3, %v2523_v0, -inf  ;;  %v1446_v19 = vsel %vm1423_vm3, %v2525_v3, -inf  ;;  %v1913_v22 = vpop.f32.mrb[13].mxu0  ;;  %v1918_v23 = vpop.f32.mrb[13].mxu1 }
 0x12b   : > { %v1445_v26 = vmax.f32 %v1437_v54, %v1444_v18  ;;  %v1447_v27 = vmax.f32 %v1439_v55, %v1446_v19 }
 0x12d   : > { %v1452_v30 = vmax.f32 %v1445_v26, %v1447_v27  ;;  %v2531_v31 = vpop.f32.mrb[14].mxu0  ;;  %v2533_v32 = vpop.f32.mrb[14].mxu1 }
 0x12e   : > { %v1448_v33 = vsel %vm1423_vm3, %v2531_v31, -inf  ;;  %v1450_v34 = vsel %vm1423_vm3, %v2533_v32, -inf  ;;  %v1923_v35 = vpop.f32.mrb[15].mxu0  ;;  %v1928_v36 = vpop.f32.mrb[15].mxu1 }
 0x12f   : > { %v1449_v37 = vmax.f32 %v1441_v62, %v1448_v33  ;;  %v1451_v40 = vmax.f32 %v1443_v63, %v1450_v34 }
 0x131   : > { %v1453_v41 = vmax.f32 %v1449_v37, %v1451_v40 }
 0x133   : > { %v2539_v42 = vmax.f32 %v1452_v30, %v1453_v41 }
 0x135   : > { %v1455_v43 = vsub.f32 %v2475_v20, %v2539_v42  ;;  %v1456_v44 = vsub.f32 %v2477_v21, %v2539_v42  ;;  %v1457_v45 = vsub.f32 %v2479_v24, %v2539_v42  ;;  %v1458_v46 = vsub.f32 %v2481_v25, %v2539_v42 }
 0x136   : > { %v1459_v47 = vsub.f32 %v2483_v28, %v2539_v42  ;;  %v1460_v50 = vsub.f32 %v2485_v29, %v2539_v42  ;;  %v1461_v51 = vsub.f32 %v2495_v38, %v2539_v42  ;;  %v1462_v20 = vsub.f32 %v2497_v39, %v2539_v42 }
 0x137   : > { %v1463_v21 = vsub.f32 %v2507_v48, %v2539_v42  ;;  %v1464_v24 = vsub.f32 %v2509_v49, %v2539_v42  ;;  %v1465_v25 = vsub.f32 %v2515_v56, %v2539_v42  ;;  %v1466_v28 = vsub.f32 %v2517_v57, %v2539_v42 }
 0x138   : > { %v1467_v29 = vsub.f32 %v2523_v0, %v2539_v42  ;;  %v1468_v38 = vsub.f32 %v2525_v3, %v2539_v42  ;;  %v1469_v39 = vsub.f32 %v2531_v31, %v2539_v42  ;;  %v1470_v48 = vsub.f32 %v2533_v32, %v2539_v42 }
 0x139   : > { %v1471_v52 = vmul.f32 1.442695, %v1455_v43  ;;  %v1473_v49 = vmul.f32 1.442695, %v1456_v44  ;;  %v1475_v53 = vmul.f32 1.442695, %v1457_v45 }
 0x13a   : > { %v1477_v54 = vmul.f32 1.442695, %v1458_v46  ;;  %v1479_v55 = vmul.f32 1.442695, %v1459_v47  ;;  %v1481_v56 = vmul.f32 1.442695, %v1460_v50 }
 0x13b   : > { %2002 = vpow2.f32 %v1471_v52  ;;  %v1483_v57 = vmul.f32 1.442695, %v1461_v51  ;;  %v1485_v58 = vmul.f32 1.442695, %v1462_v20  ;;  %v1487_v59 = vmul.f32 1.442695, %v1463_v21 }
 0x13c   : > { %2004 = vpow2.f32 %v1473_v49  ;;  %v1489_v62 = vmul.f32 1.442695, %v1464_v24  ;;  %v1491_v23 = vmul.f32 1.442695, %v1465_v25  ;;  %v1493_v34 = vmul.f32 1.442695, %v1466_v28 }
 0x13d   : > { %2006 = vpow2.f32 %v1475_v53  ;;  %v1495_v40 = vmul.f32 1.442695, %v1467_v29  ;;  %v1497_v47 = vmul.f32 1.442695, %v1468_v38  ;;  %v1499_v25 = vmul.f32 1.442695, %v1469_v39 }
 0x13e   : > { %2008 = vpow2.f32 %v1477_v54  ;;  %v1501_v53 = vmul.f32 1.442695, %v1470_v48 }
 0x13f   : > { %2010 = vpow2.f32 %v1479_v55 }
 0x140   : > { %2012 = vpow2.f32 %v1481_v56 }
 0x141   : > { %2014 = vpow2.f32 %v1483_v57 }
 0x142   : > { %2016 = vpow2.f32 %v1485_v58 }
 0x143   : > { %2018 = vpow2.f32 %v1487_v59 }
 0x144   : > { %2020 = vpow2.f32 %v1489_v62 }
 0x145   : > { %v2003_v60 = vpop.eup %2002  ;;  %2022 = vpow2.f32 %v1491_v23 }
 0x146   : > { %v2005_v61 = vpop.eup %2004  ;;  %v1503_v63 = vsel %vm1423_vm3, %v2003_v60, 0.0  ;;  %v1534_v0 = vmul.f32 %v2003_v60, %v2311_v1  ;;  %2024 = vpow2.f32 %v1493_v34 }
 0x147   : > { %v2007_v3 = vpop.eup %2006  ;;  %v1504_v18 = vsel %vm1423_vm3, %v2005_v61, 0.0  ;;  %v1535_v19 = vmul.f32 %v2005_v61, %v2314_v2  ;;  %2026 = vpow2.f32 %v1495_v40 }
 0x148   : > { %v2009_v22 = vpop.eup %2008  ;;  %v1505_v26 = vadd.f32 %v1504_v18, %v1503_v63  ;;  %v1506_v27 = vsel %vm1423_vm3, %v2007_v3, 0.0  ;;  %v1536_v30 = vmul.f32 %v2007_v3, %v2326_v4  ;;  %v1550_v31 = vsel %vm1423_vm3, %v1534_v0, 0.0 }
 0x149   : > { %v2011_v33 = vpop.eup %2010  ;;  %v1508_v1 = vsel %vm1423_vm3, %v2009_v22, 0.0  ;;  %v1537_v36 = vmul.f32 %v2009_v22, %v2333_v5  ;;  %v1551_v2 = vsel %vm1423_vm3, %v1535_v19, 0.0  ;;  %2028 = vpow2.f32 %v1497_v47 }
 0x14a   : > { %v1507_v35 = vadd.f32 %v1506_v27, %v1505_v26  ;;  %v2013_v37 = vpop.eup %2012  ;;  %v1552_v43 = vadd.f32 %v1551_v2, %v1550_v31  ;;  %v1510_v44 = vsel %vm1423_vm3, %v2011_v33, 0.0  ;;  %v1538_v4 = vmul.f32 %v2011_v33, %v2346_v6 }
 0x14b   : > { %v1553_v45 = vsel %vm1423_vm3, %v1536_v30, 0.0  ;;  %v2015_v46 = vpop.eup %2014  ;;  %v1512_v5 = vsel %vm1423_vm3, %v2013_v37, 0.0  ;;  %v1539_v20 = vmul.f32 %v2013_v37, %v2353_v7  ;;  %v1555_v21 = vsel %vm1423_vm3, %v1537_v36, 0.0 }
 0x14c   : > { %v1509_v41 = vadd.f32 %v1508_v1, %v1507_v35  ;;  %v1554_v51 = vadd.f32 %v1553_v45, %v1552_v43  ;;  %v2017_v24 = vpop.eup %2016  ;;  %v1514_v6 = vsel %vm1423_vm3, %v2015_v46, 0.0  ;;  %v1540_v52 = vmul.f32 %v2015_v46, %v2366_v8 }
 0x14d   : > { %v1557_v49 = vsel %vm1423_vm3, %v1538_v4, 0.0  ;;  %v2019_v38 = vpop.eup %2018  ;;  %v1516_v55 = vsel %vm1423_vm3, %v2017_v24, 0.0  ;;  %v1541_v39 = vmul.f32 %v2017_v24, %v2373_v9  ;;  %v1559_v56 = vsel %vm1423_vm3, %v1539_v20, 0.0 }
 0x14e   : > { %v1511_v50 = vadd.f32 %v1510_v44, %v1509_v41  ;;  %v1556_v29 = vadd.f32 %v1555_v21, %v1554_v51  ;;  %v2021_v57 = vpop.eup %2020  ;;  %2030 = vpow2.f32 %v1499_v25  ;;  %v1518_v59 = vsel %vm1423_vm3, %v2019_v38, 0.0 }
 0x14f   : > { %v1542_v60 = vmul.f32 %v2019_v38, %v2386_v10  ;;  %v1561_v61 = vsel %vm1423_vm3, %v1540_v52, 0.0  ;;  %v2023_v32 = vpop.eup %2022  ;;  %2032 = vpow2.f32 %v1501_v53  ;;  %v1520_v62 = vsel %vm1423_vm3, %v2021_v57, 0.0 }
 0x150   : > { %v1513_v28 = vadd.f32 %v1512_v5, %v1511_v50  ;;  %v1558_v54 = vadd.f32 %v1557_v49, %v1556_v29  ;;  %v1543_v9 = vmul.f32 %v2021_v57, %v2393_v11  ;;  %v1563_v63 = vsel %vm1423_vm3, %v1541_v39, 0.0  ;;  %v2025_v0 = vpop.eup %2024  ;;  %v1583_v49 = vld [vmem:[%s2685_s2] sm:$0xff] }
 0x151   : > { %v1522_v19 = vsel %vm1423_vm3, %v2023_v32, 0.0  ;;  %v1544_v22 = vmul.f32 %v2023_v32, %v2406_v12  ;;  %v1565_v10 = vsel %vm1423_vm3, %v1542_v60, 0.0  ;;  %v2027_v23 = vpop.eup %2026  ;;  %v1524_v30 = vsel %vm1423_vm3, %v2025_v0, 0.0 }
 0x152   : > { %v1515_v7 = vadd.f32 %v1514_v6, %v1513_v28  ;;  %v1560_v8 = vadd.f32 %v1559_v56, %v1558_v54  ;;  %v1545_v31 = vmul.f32 %v2025_v0, %v2413_v13  ;;  %v1567_v11 = vsel %vm1423_vm3, %v1543_v9, 0.0 }
 0x153   : > { %v2029_v33 = vpop.eup %2028  ;;  %v1526_v1 = vsel %vm1423_vm3, %v2027_v23, 0.0  ;;  %v1546_v36 = vmul.f32 %v2027_v23, %v2426_v14  ;;  %v1569_v12 = vsel %vm1423_vm3, %v1544_v22, 0.0 }
 0x154   : > { %v1517_v58 = vadd.f32 %v1516_v55, %v1515_v7  ;;  %v1562_v48 = vadd.f32 %v1561_v61, %v1560_v8  ;;  %v1528_v41 = vsel %vm1423_vm3, %v2029_v33, 0.0  ;;  %v1547_v43 = vmul.f32 %v2029_v33, %v2433_v15 }
 0x155   : > { %v1571_v13 = vsel %vm1423_vm3, %v1545_v31, 0.0  ;;  %v1573_v14 = vsel %vm1423_vm3, %v1546_v36, 0.0 }
 0x156   : > { %v1519_v42 = vadd.f32 %v1518_v59, %v1517_v58  ;;  %v1564_v18 = vadd.f32 %v1563_v63, %v1562_v48  ;;  %v1575_v15 = vsel %vm1423_vm3, %v1547_v43, 0.0 }
 0x158   : > { %v1521_v3 = vadd.f32 %v1520_v62, %v1519_v42  ;;  %v1566_v27 = vadd.f32 %v1565_v10, %v1564_v18  ;;  %v2031_v2 = vpop.eup %2030 }
 0x159   : > { %v2033_v44 = vpop.eup %2032  ;;  %v1530_v46 = vsel %vm1423_vm3, %v2031_v2, 0.0  ;;  %v1548_v47 = vmul.f32 %v2031_v2, %v2446_v16 }
 0x15a   : > { %v1523_v26 = vadd.f32 %v1522_v19, %v1521_v3  ;;  %v1568_v35 = vadd.f32 %v1567_v11, %v1566_v27  ;;  %v1532_v5 = vsel %vm1423_vm3, %v2033_v44, 0.0  ;;  %v1549_v20 = vmul.f32 %v2033_v44, %v2453_v17  ;;  %v1588_v17 = vpop.permute.xlu0 %1587 }
 0x15b   : > { %v1577_v25 = vsel %vm1423_vm3, %v1548_v47, 0.0 }
 0x15c   : > { %v1525_v34 = vadd.f32 %v1524_v30, %v1523_v26  ;;  %v1570_v40 = vadd.f32 %v1569_v12, %v1568_v35  ;;  %v1579_v16 = vsel %vm1423_vm3, %v1549_v20, 0.0 }
 0x15e   : > { %v1527_v37 = vadd.f32 %v1526_v1, %v1525_v34  ;;  %v1572_v45 = vadd.f32 %v1571_v13, %v1570_v40 }
 0x160   : > { %v1529_v4 = vadd.f32 %v1528_v41, %v1527_v37  ;;  %v1574_v51 = vadd.f32 %v1573_v14, %v1572_v45 }
 0x162   : > { %v1531_v50 = vadd.f32 %v1530_v46, %v1529_v4  ;;  %v1576_v24 = vadd.f32 %v1575_v15, %v1574_v51 }
 0x164   : > { %v1533_v21 = vadd.f32 %v1532_v5, %v1531_v50  ;;  %v1578_v28 = vadd.f32 %v1577_v25, %v1576_v24 }
 0x166   : > { %2034 = vrcp.f32 %v1533_v21  ;;  %v1580_v29 = vadd.f32 %v1579_v16, %v1578_v28 }
 0x170   : > { %v2035_v6 = vpop.eup %2034 }
 0x171   : > { %v1582_v52 = vmul.f32 %v2035_v6, %v1580_v29 }
 0x173   : > { %1930 = vmatpush3.msk.msra.mxu0 %vm254_vm1, %v1582_v52 }
 0x174   : > { %1932 = vmatmul.mubr.msk.f32.vlgmr.msra.gmra.mrb[16].mxu0 %vm250_vm2, %v1583_v49 }
 0x247   : > { %v1662_v38 = vpop.f32.mrb[16].mxu0 }
 0x248   : > { %v1663_v53 = vadd.f32 %v1662_v38, %v1588_v17  ;;  %v1933_v7 = vpop.f32.mrb[17].mxu0 }
 0x24a   : > { %v1666_v54 = vmul.f32 0.2, %v1663_v53 }
 0x24c   : > { %v1667_v55 = vmax.f32 %v1663_v53, %v1666_v54 }
 0x24e   : > { %1669 = vst.msk [vmem:[%s232_s8] sm:$0xff] %vm1668_vm4, %v1667_v55 }
 0x24f   : > { %2079 = shalt.err (!%p2076_p5)
}
 0x250   : > { %s2080_s22 = scalar_lea.hbm %s2634_s24, 128  ;;  %s2084_s14 = scalar_lea.hbm %s2687_s4, 256 }
 0x251   : > { %p2081_p4 = scmp.ne.s32.totalorder %s2634_s24, %s2080_s22  ;;  %p2085_p12 = scmp.lt.u32.totalorder %s2634_s24, %s2687_s4 }
 0x252   : > { %p2086_p1 = scmp.lt.u32.totalorder %s2084_s14, %s2080_s22  ;;  %p2088_p8 = scmp.lt.u32.totalorder %s2080_s22, %s2634_s24 }
 0x253   : > { %p2082_p7 = pnand %p2081_p4, %p2695_p9 }
 0x254   : > { %p2087_p3 = por %p2086_p1, %p2085_p12 }
 0x255   : > { %p2083_p10 = pneg %p2082_p7 }
 0x256   : > { %p2089_p11 = por %p2088_p8, %p2087_p3 }
 0x258   : > { %p2090_p0 = pnand %p2089_p11, %p2083_p10 }
 0x25a   : > { %2093 = shalt.err (!%p2090_p0)
}
 0x25b   : > { %1936 = dma.vmem_to_hbm [thread:$0]  (%p2695_p9), %s2636_s9, 128, %s2634_s24, %s1671_s25  }
 0x25c PF: > { %s1697_s7 = sand.u32 1, %s2128_s15   ;;  %p2696_p6 = scmp.ne.s32.totalorder %s2692_s30, 0 }
 0x25d   : > { %p2697_p13 = scmp.ge.s32.totalorder %s2148_s20, 2  ;;  %s1698_s8 = scalar_lea.sflag [#allocation4], %s1697_s7 }
 0x25f   : > { %p1943_p2 = pnand %p2697_p13, %p2696_p6 }
 0x261   : > { %2123 = dma.done.wait (!%p1943_p2), %s1698_s8, 128  }
 0x262   : > { %2125 = vsyncadd (!%p1943_p2), %s1698_s8, 4294967168  ;;  %s20_s20 = sadd.s32 1, %s2148_s20   ;;  %s2698_s15 = smov %s2132_s16 }
 0x263   : > { %p17_p5 = scmp.ge.s32.totalorder %s20_s20, 4   ;;  %s2699_s16 = smov %s2136_s17 }
 0x264   : > { %s2700_s17 = smov %s2238_s29  ;;  %s2701_s18 = smov %s2144_s19 }
 0x265   : > { %s2702_s19 = smov %s2704_s23  ;;  %19 = sbr.rel (!%p17_p5) target bundleno = 6 (0x6), region = 81 }
 0x26c   :  { %1703 = vsyncpa [#allocation3], 1 }
 0x26d   :  { %1705 = vsyncpa [#allocation3 + $0x1], 1 }
 0x26e   :  { %1706 = vsyncpa [#allocation4], 1 }
 0x26f   :  { %1708 = vsyncpa [#allocation4 + $0x1], 1 }

</bundles_post_ra>
